<compile_context>
chip_gen: v7x
topology: tpu7x:2x2x1
jax: 0.10.0
libtpu: 0.0.40
codegen_flags: <defaults>
</compile_context>

<pallas_src>
import jax
import jax.numpy as jnp
from jax.experimental import pallas as pl
from jax.experimental.pallas import tpu as pltpu


def _round_up(n, m):
    return ((n + m - 1) // m) * m


def vae_kernel(x_ref, eps_ref,
               w1_ref, b1_ref,
               wmv_ref, bmv_ref,
               wd_ref, bd_ref,
               wo_ref, bo_ref,
               out_ref):
    """One batch tile: full encoder -> reparam -> decoder, packed output."""
    z_dim = eps_ref.shape[-1]
    cdtype = w1_ref.dtype          # matmul input dtype (f32 or bf16)

    x = x_ref[...]

    # ----- encoder MLP: Linear -> tanh (dropout p=0 is identity) -----
    h = jnp.tanh(
        jnp.dot(x, w1_ref[...], preferred_element_type=jnp.float32) + b1_ref[...]
    )

    # ----- bottleneck: fused [inf_mean | inf_logvar] in one MXU push -----
    zmv = (jnp.dot(h.astype(cdtype), wmv_ref[...],
                   preferred_element_type=jnp.float32) + bmv_ref[...])
    z_mean = zmv[:, :z_dim]
    z_logvar = zmv[:, z_dim:]

    # ----- reparameterization (f32 elementwise path; v5e-safe) -----
    z = z_mean + eps_ref[...] * jnp.exp(0.5 * z_logvar)

    # ----- decoder MLP: Linear -> tanh -----
    h2 = jnp.tanh(
        jnp.dot(z.astype(cdtype), wd_ref[...],
                preferred_element_type=jnp.float32) + bd_ref[...]
    )

    # ----- output head -----
    y = (jnp.dot(h2.astype(cdtype), wo_ref[...],
                 preferred_element_type=jnp.float32) + bo_ref[...])

    # single lane-dense store: [y | z | z_mean | z_logvar]
    out_ref[...] = jnp.concatenate(
        [y, z, z_mean, z_logvar], axis=-1).astype(out_ref.dtype)


def vae_forward(x, eps, params, *, tile_b=128, compute_dtype=jnp.bfloat16):
    """Full VAE forward; batch-tiled grid, weights resident in VMEM."""
    B, x_dim = x.shape
    z_dim = eps.shape[1]
    hidden = params["w1"].shape[1]

    # ---- fuse inf_mean / inf_logvar weights into one (hidden, 2*z_dim) matmul ----
    wmv = jnp.concatenate([params["wm"], params["wv"]], axis=1)
    bmv = jnp.concatenate([params["bm"], params["bv"]], axis=1)

    # ---- batch tiling (keep sublane dim a multiple of 8) ----
    tile_b = _round_up(max(8, min(tile_b, _round_up(B, 8))), 8)
    b_pad = _round_up(B, tile_b)
    grid = (b_pad // tile_b,)
    pad = b_pad - B

    x_p = jnp.pad(x, ((0, pad), (0, 0))).astype(compute_dtype)
    eps_p = jnp.pad(eps, ((0, pad), (0, 0))).astype(jnp.float32)

    w1 = params["w1"].astype(compute_dtype)
    wd = params["wd"].astype(compute_dtype)
    wo = params["wo"].astype(compute_dtype)
    wmv = wmv.astype(compute_dtype)
    b1 = params["b1"].astype(jnp.float32)
    bd = params["bd"].astype(jnp.float32)
    bo = params["bo"].astype(jnp.float32)
    bmv = bmv.astype(jnp.float32)

    out_w = x_dim + 3 * z_dim
    ins = (x_p, eps_p, w1, b1, wmv, bmv, wd, bd, wo, bo)

    def batch_spec(d):                      # tiled over batch
        return pl.BlockSpec((tile_b, d), lambda i: (i, 0))

    def whole_spec(a):                      # resident whole-array (weights/biases)
        return pl.BlockSpec(a.shape, lambda i: (0, 0))

    in_specs = [batch_spec(x_dim), batch_spec(z_dim)] + [whole_spec(a) for a in ins[2:]]

    flops = 2 * b_pad * (x_dim * hidden + hidden * 2 * z_dim
                         + z_dim * hidden + hidden * x_dim)
    transcendentals = b_pad * (2 * hidden + z_dim)       # tanh x2 + exp
    bytes_accessed = (sum(int(a.size) * a.dtype.itemsize for a in ins)
                      + b_pad * out_w * 4)

    packed = pl.pallas_call(
        vae_kernel,
        out_shape=jax.ShapeDtypeStruct((b_pad, out_w), jnp.float32),
        grid=grid,
        in_specs=in_specs,
        out_specs=batch_spec(out_w),
        compiler_params=pltpu.CompilerParams(
            dimension_semantics=("parallel",)),
        cost_estimate=pl.CostEstimate(
            flops=flops,
            transcendentals=transcendentals,
            bytes_accessed=bytes_accessed),
    )(*ins)

    # split the packed slab (and drop batch padding)
    y = packed[:B, :x_dim]
    z = packed[:B, x_dim:x_dim + z_dim]
    z_mean = packed[:B, x_dim + z_dim:x_dim + 2 * z_dim]
    z_logvar = packed[:B, x_dim + 2 * z_dim:]

    # priors from forward(): zeros_like(z_mean) -- glue, no kernel needed
    z_mean_p = jnp.zeros_like(z_mean)
    z_logvar_p = jnp.zeros_like(z_logvar)
    return y, z, z_mean, z_logvar, z_mean_p, z_logvar_p


def make_params(key, x_dim, z_dim, hidden):
    """Deterministic synthetic weights, PyTorch-Linear shapes transposed to (in,out)."""
    ks = jax.random.split(key, 10)

    def lin(kw, kb, d_in, d_out):
        bound = 1.0 / jnp.sqrt(d_in)          # torch default init
        w = jax.random.uniform(kw, (d_in, d_out), jnp.float32, -bound, bound)
        b = jax.random.uniform(kb, (1, d_out), jnp.float32, -bound, bound)
        return w, b

    w1, b1 = lin(ks[0], ks[1], x_dim, hidden)   # mlp_x_z linear0
    wm, bm = lin(ks[2], ks[3], hidden, z_dim)   # inf_mean
    wv, bv = lin(ks[4], ks[5], hidden, z_dim)   # inf_logvar
    wd, bd = lin(ks[6], ks[7], z_dim, hidden)   # mlp_z_x linear0
    wo, bo = lin(ks[8], ks[9], hidden, x_dim)   # gen_out
    return dict(w1=w1, b1=b1, wm=wm, bm=bm, wv=wv, bv=bv,
                wd=wd, bd=bd, wo=wo, bo=bo)


if __name__ == "__main__":
    B = 256        # flattened (batch, seq) frames -> multi-step grid
    X_DIM = 32     # x_dim
    Z_DIM = 16     # z_dim (module default)
    HIDDEN = 128   # dense_x_z = [128] (module default)
    TILE_B = 128   # batch tile per grid step

    key = jax.random.PRNGKey(0)
    k_x, k_eps, k_p = jax.random.split(key, 3)

    x = jax.random.normal(k_x, (B, X_DIM), jnp.float32)
    eps = jax.random.normal(k_eps, (B, Z_DIM), jnp.float32)  # torch.randn_like(std)
    params = make_params(k_p, X_DIM, Z_DIM, HIDDEN)

    # pure-JAX reference of the same math (highest precision)
    hp = jax.lax.Precision.HIGHEST
    h_ref = jnp.tanh(jnp.dot(x, params["w1"], precision=hp) + params["b1"])
    zm_ref = jnp.dot(h_ref, params["wm"], precision=hp) + params["bm"]
    zlv_ref = jnp.dot(h_ref, params["wv"], precision=hp) + params["bv"]
    z_ref = zm_ref + eps * jnp.exp(0.5 * zlv_ref)
    h2_ref = jnp.tanh(jnp.dot(z_ref, params["wd"], precision=hp) + params["bd"])
    y_ref = jnp.dot(h2_ref, params["wo"], precision=hp) + params["bo"]

    # ---- f32 path (reference-accuracy check) ----
    y, z, zm, zlv, zmp, zlvp = vae_forward(
        x, eps, params, tile_b=TILE_B, compute_dtype=jnp.float32)
    jax.block_until_ready((y, z, zm, zlv))
    assert y.shape == (B, X_DIM) and z.shape == (B, Z_DIM)
    assert jnp.allclose(y, y_ref, atol=5e-2, rtol=5e-2)
    assert jnp.allclose(z, z_ref, atol=5e-2, rtol=5e-2)
    assert jnp.allclose(zm, zm_ref, atol=5e-2, rtol=5e-2)
    assert jnp.allclose(zlv, zlv_ref, atol=5e-2, rtol=5e-2)
    assert bool(jnp.all(zmp == 0)) and bool(jnp.all(zlvp == 0))

    # ---- bf16 matmul path (v6e/v7x fast path), loose numeric check ----
    y16, z16, zm16, zlv16, _, _ = vae_forward(
        x, eps, params, tile_b=TILE_B, compute_dtype=jnp.bfloat16)
    jax.block_until_ready((y16, z16))
    assert jnp.allclose(y16, y_ref, atol=0.2, rtol=0.2)
    assert jnp.allclose(z16, z_ref, atol=0.2, rtol=0.2)

    print("KERNEL_OK")
</pallas_src>

<mosaic_0001>
module attributes {stable_mosaic.version = 11 : i64} {
  func.func @vae_kernel(%arg0: i32, %arg1: memref<128x32xf32, #tpu.memory_space<vmem>>, %arg2: memref<128x16xf32, #tpu.memory_space<vmem>>, %arg3: memref<32x128xf32, #tpu.memory_space<vmem>>, %arg4: memref<1x128xf32, #tpu.memory_space<vmem>>, %arg5: memref<128x32xf32, #tpu.memory_space<vmem>>, %arg6: memref<1x32xf32, #tpu.memory_space<vmem>>, %arg7: memref<16x128xf32, #tpu.memory_space<vmem>>, %arg8: memref<1x128xf32, #tpu.memory_space<vmem>>, %arg9: memref<128x32xf32, #tpu.memory_space<vmem>>, %arg10: memref<1x32xf32, #tpu.memory_space<vmem>>, %arg11: memref<128x80xf32, #tpu.memory_space<vmem>>) attributes {dimension_semantics = [#tpu.dimension_semantics<parallel>], iteration_bounds = array<i64: 2>, scalar_prefetch = 0 : i64, scratch_operands = 0 : i64, tpu.core_type = #tpu.core_type<tc>, window_params = [{transform_indices = @transform_0, window_bounds = array<i64: 128, 32>}, {transform_indices = @transform_1, window_bounds = array<i64: 128, 16>}, {pipeline_mode = #tpu.pipeline_mode<synchronous>, transform_indices = @transform_2, window_bounds = array<i64: 32, 128>}, {pipeline_mode = #tpu.pipeline_mode<synchronous>, transform_indices = @transform_3, window_bounds = array<i64: 1, 128>}, {pipeline_mode = #tpu.pipeline_mode<synchronous>, transform_indices = @transform_4, window_bounds = array<i64: 128, 32>}, {pipeline_mode = #tpu.pipeline_mode<synchronous>, transform_indices = @transform_5, window_bounds = array<i64: 1, 32>}, {pipeline_mode = #tpu.pipeline_mode<synchronous>, transform_indices = @transform_6, window_bounds = array<i64: 16, 128>}, {pipeline_mode = #tpu.pipeline_mode<synchronous>, transform_indices = @transform_7, window_bounds = array<i64: 1, 128>}, {pipeline_mode = #tpu.pipeline_mode<synchronous>, transform_indices = @transform_8, window_bounds = array<i64: 128, 32>}, {pipeline_mode = #tpu.pipeline_mode<synchronous>, transform_indices = @transform_9, window_bounds = array<i64: 1, 32>}, {transform_indices = @transform_10, window_bounds = array<i64: 128, 80>}]} {
    %c0 = arith.constant 0 : index
    %c0_0 = arith.constant 0 : index
    %0 = vector.load %arg1[%c0, %c0_0] : memref<128x32xf32, #tpu.memory_space<vmem>>, vector<128x32xf32>
    %c0_1 = arith.constant 0 : index
    %c0_2 = arith.constant 0 : index
    %1 = vector.load %arg3[%c0_1, %c0_2] : memref<32x128xf32, #tpu.memory_space<vmem>>, vector<32x128xf32>
    %cst = arith.constant dense<0.000000e+00> : vector<128x128xf32>
    %2 = tpu.matmul %0, %1, %cst {dimension_numbers = #tpu.dot_dimension_numbers<[1], [0], [0], [1], [0, 0, 1, 1], [], []>} : vector<128x32xf32>, vector<32x128xf32>, vector<128x128xf32> -> vector<128x128xf32>
    %c0_3 = arith.constant 0 : index
    %c0_4 = arith.constant 0 : index
    %3 = vector.load %arg4[%c0_3, %c0_4] : memref<1x128xf32, #tpu.memory_space<vmem>>, vector<1x128xf32>
    %4 = vector.broadcast %3 : vector<1x128xf32> to vector<128x128xf32>
    %5 = arith.addf %2, %4 : vector<128x128xf32>
    %6 = math.tanh %5 : vector<128x128xf32>
    %c0_5 = arith.constant 0 : index
    %c0_6 = arith.constant 0 : index
    %7 = vector.load %arg5[%c0_5, %c0_6] : memref<128x32xf32, #tpu.memory_space<vmem>>, vector<128x32xf32>
    %cst_7 = arith.constant dense<0.000000e+00> : vector<128x32xf32>
    %8 = tpu.matmul %6, %7, %cst_7 {dimension_numbers = #tpu.dot_dimension_numbers<[1], [0], [0], [1], [0, 0, 1, 1], [], []>} : vector<128x128xf32>, vector<128x32xf32>, vector<128x32xf32> -> vector<128x32xf32>
    %c0_8 = arith.constant 0 : index
    %c0_9 = arith.constant 0 : index
    %9 = vector.load %arg6[%c0_8, %c0_9] : memref<1x32xf32, #tpu.memory_space<vmem>>, vector<1x32xf32>
    %10 = vector.broadcast %9 : vector<1x32xf32> to vector<128x32xf32>
    %11 = arith.addf %8, %10 : vector<128x32xf32>
    %12 = vector.extract_strided_slice %11 {offsets = [0, 0], sizes = [128, 16], strides = [1, 1]} : vector<128x32xf32> to vector<128x16xf32>
    %13 = vector.extract_strided_slice %11 {offsets = [0, 16], sizes = [128, 16], strides = [1, 1]} : vector<128x32xf32> to vector<128x16xf32>
    %c0_10 = arith.constant 0 : index
    %c0_11 = arith.constant 0 : index
    %14 = vector.load %arg2[%c0_10, %c0_11] : memref<128x16xf32, #tpu.memory_space<vmem>>, vector<128x16xf32>
    %cst_12 = arith.constant 5.000000e-01 : f32
    %15 = vector.broadcast %cst_12 : f32 to vector<128x16xf32>
    %16 = arith.mulf %15, %13 : vector<128x16xf32>
    %17 = math.exp %16 : vector<128x16xf32>
    %18 = arith.mulf %14, %17 : vector<128x16xf32>
    %19 = arith.addf %12, %18 : vector<128x16xf32>
    %c0_13 = arith.constant 0 : index
    %c0_14 = arith.constant 0 : index
    %20 = vector.load %arg7[%c0_13, %c0_14] : memref<16x128xf32, #tpu.memory_space<vmem>>, vector<16x128xf32>
    %cst_15 = arith.constant dense<0.000000e+00> : vector<128x128xf32>
    %21 = tpu.matmul %19, %20, %cst_15 {dimension_numbers = #tpu.dot_dimension_numbers<[1], [0], [0], [1], [0, 0, 1, 1], [], []>} : vector<128x16xf32>, vector<16x128xf32>, vector<128x128xf32> -> vector<128x128xf32>
    %c0_16 = arith.constant 0 : index
    %c0_17 = arith.constant 0 : index
    %22 = vector.load %arg8[%c0_16, %c0_17] : memref<1x128xf32, #tpu.memory_space<vmem>>, vector<1x128xf32>
    %23 = vector.broadcast %22 : vector<1x128xf32> to vector<128x128xf32>
    %24 = arith.addf %21, %23 : vector<128x128xf32>
    %25 = math.tanh %24 : vector<128x128xf32>
    %c0_18 = arith.constant 0 : index
    %c0_19 = arith.constant 0 : index
    %26 = vector.load %arg9[%c0_18, %c0_19] : memref<128x32xf32, #tpu.memory_space<vmem>>, vector<128x32xf32>
    %cst_20 = arith.constant dense<0.000000e+00> : vector<128x32xf32>
    %27 = tpu.matmul %25, %26, %cst_20 {dimension_numbers = #tpu.dot_dimension_numbers<[1], [0], [0], [1], [0, 0, 1, 1], [], []>} : vector<128x128xf32>, vector<128x32xf32>, vector<128x32xf32> -> vector<128x32xf32>
    %c0_21 = arith.constant 0 : index
    %c0_22 = arith.constant 0 : index
    %28 = vector.load %arg10[%c0_21, %c0_22] : memref<1x32xf32, #tpu.memory_space<vmem>>, vector<1x32xf32>
    %29 = vector.broadcast %28 : vector<1x32xf32> to vector<128x32xf32>
    %30 = arith.addf %27, %29 : vector<128x32xf32>
    %31 = tpu.concatenate %30, %19, %12, %13 in 1 : vector<128x32xf32>, vector<128x16xf32>, vector<128x16xf32>, vector<128x16xf32> -> vector<128x80xf32>
    %c0_23 = arith.constant 0 : index
    %c0_24 = arith.constant 0 : index
    %32 = vector.load %arg11[%c0_23, %c0_24] : memref<128x80xf32, #tpu.memory_space<vmem>>, vector<128x80xf32>
    tpu.vector_store %arg11[%c0_23, %c0_24], %31 {strides = array<i32>} : memref<128x80xf32, #tpu.memory_space<vmem>>, vector<128x80xf32>,
    return
  }
  func.func @transform_0(%arg0: i32) -> (i32, i32) {
    %c0_i32 = arith.constant 0 : i32
    %c0_i32_0 = arith.constant 0 : i32
    return %arg0, %c0_i32 : i32, i32
  }
  func.func @transform_1(%arg0: i32) -> (i32, i32) {
    %c0_i32 = arith.constant 0 : i32
    %c0_i32_0 = arith.constant 0 : i32
    return %arg0, %c0_i32 : i32, i32
  }
  func.func @transform_2(%arg0: i32) -> (i32, i32) {
    %c0_i32 = arith.constant 0 : i32
    %c0_i32_0 = arith.constant 0 : i32
    %c0_i32_1 = arith.constant 0 : i32
    return %c0_i32, %c0_i32_0 : i32, i32
  }
  func.func @transform_3(%arg0: i32) -> (i32, i32) {
    %c0_i32 = arith.constant 0 : i32
    %c0_i32_0 = arith.constant 0 : i32
    %c0_i32_1 = arith.constant 0 : i32
    return %c0_i32, %c0_i32_0 : i32, i32
  }
  func.func @transform_4(%arg0: i32) -> (i32, i32) {
    %c0_i32 = arith.constant 0 : i32
    %c0_i32_0 = arith.constant 0 : i32
    %c0_i32_1 = arith.constant 0 : i32
    return %c0_i32, %c0_i32_0 : i32, i32
  }
  func.func @transform_5(%arg0: i32) -> (i32, i32) {
    %c0_i32 = arith.constant 0 : i32
    %c0_i32_0 = arith.constant 0 : i32
    %c0_i32_1 = arith.constant 0 : i32
    return %c0_i32, %c0_i32_0 : i32, i32
  }
  func.func @transform_6(%arg0: i32) -> (i32, i32) {
    %c0_i32 = arith.constant 0 : i32
    %c0_i32_0 = arith.constant 0 : i32
    %c0_i32_1 = arith.constant 0 : i32
    return %c0_i32, %c0_i32_0 : i32, i32
  }
  func.func @transform_7(%arg0: i32) -> (i32, i32) {
    %c0_i32 = arith.constant 0 : i32
    %c0_i32_0 = arith.constant 0 : i32
    %c0_i32_1 = arith.constant 0 : i32
    return %c0_i32, %c0_i32_0 : i32, i32
  }
  func.func @transform_8(%arg0: i32) -> (i32, i32) {
    %c0_i32 = arith.constant 0 : i32
    %c0_i32_0 = arith.constant 0 : i32
    %c0_i32_1 = arith.constant 0 : i32
    return %c0_i32, %c0_i32_0 : i32, i32
  }
  func.func @transform_9(%arg0: i32) -> (i32, i32) {
    %c0_i32 = arith.constant 0 : i32
    %c0_i32_0 = arith.constant 0 : i32
    %c0_i32_1 = arith.constant 0 : i32
    return %c0_i32, %c0_i32_0 : i32, i32
  }
  func.func @transform_10(%arg0: i32) -> (i32, i32) {
    %c0_i32 = arith.constant 0 : i32
    %c0_i32_0 = arith.constant 0 : i32
    return %arg0, %c0_i32 : i32, i32
  }
}

</mosaic_0001>

<bundles_post_ra>
// kernel: tpu_custom_call.1
= control target key start
LH: loop header
LB: loop body
LE: loop exit
PB: predicated region body
PF: predicated region fallthrough
CT: control target
= control target key end

     0   :  { %s2172_s13 = smov 0   ;;  %s2709_s0 = inlined_call_operand.vmem [shape: f32[256,32], index: 0, kind: input, shape index: {}]   ;;  %s2710_s1 = inlined_call_operand.vmem [shape: f32[256,16], index: 1, kind: input, shape index: {}]   ;;  %s2711_s2 = inlined_call_operand.vmem [shape: f32[32,128], index: 2, kind: input, shape index: {}]   ;;  %s2712_s3 = inlined_call_operand.vmem [shape: f32[1,128], index: 3, kind: input, shape index: {}]   ;;  %s2713_s4 = inlined_call_operand.vmem [shape: f32[128,32], index: 4, kind: input, shape index: {}]   ;;  %s2714_s5 = inlined_call_operand.vmem [shape: f32[1,32], index: 5, kind: input, shape index: {}]   ;;  %s2715_s6 = inlined_call_operand.vmem [shape: f32[16,128], index: 6, kind: input, shape index: {}]   ;;  %s2716_s7 = inlined_call_operand.vmem [shape: f32[1,128], index: 7, kind: input, shape index: {}]   ;;  %s2717_s8 = inlined_call_operand.vmem [shape: f32[128,32], index: 8, kind: input, shape index: {}]   ;;  %s2718_s9 = inlined_call_operand.vmem [shape: f32[1,32], index: 9, kind: input, shape index: {}]   ;;  %s2719_s10 = inlined_call_operand.vmem [shape: f32[256,80], index: 10, kind: output, shape index: {}]  }
   0x1 LB: > { %s1584_s14 = sadd.s32 4294967295, %s2112_s13   ;;  %p1588_p0 = scmp.ge.s32.totalorder %s2112_s13, 1  ;;  %s2112_s13 = sphi %s2172_s13, %s20_s13  }
   0x2   : > { %p324_p1 = scmp.lt.s32.totalorder %s2112_s13, 3 }
   0x4   : > { %p325_p2 = pnand %p1588_p0, %p324_p1 }
   0x5   : > { %v401_v0 = vld [vmem:[%s2711_s2] sm:$0xff] (!%p325_p2)  ;;  %v402_v1 = vld [vmem:[%s2711_s2 + $0x8] sm:$0xff] (!%p325_p2)  ;;  %v403_v2 = vld [vmem:[%s2711_s2 + $0x10] sm:$0xff] (!%p325_p2)  ;;  %s1589_s21 = sshll.u32 (!%p325_p2), %s1584_s14, 4  ;;  %vm412_vm0 = vcmask (!%p325_p2), 261120   ;;  %s2114_s11 = smov (!%p325_p2), 112  }
   0x6   : > { %328 = sbr.rel (%p325_p2) target bundleno = 1073 (0x431), region = 60  ;;  %v1907_v3 = vpack.c.bf16 (!%p325_p2), %v402_v1, %v401_v0  ;;  %v404_v4 = vld [vmem:[%s2711_s2 + $0x18] sm:$0xff] (!%p325_p2)  ;;  %p368_p3 = scmp.lt.s32.totalorder (!%p325_p2), %s1589_s21, 31  ;;  %v622_v5 = vld [vmem:[%s2713_s4] sm:$0xff] (!%p325_p2)  ;;  %v623_v6 = vld [vmem:[%s2713_s4 + $0x8] sm:$0xff] (!%p325_p2)  ;;  %vm959_vm1 = vcmask (!%p325_p2), 130048  }
   0x7   : > { %v1911_v7 = vpack.c.bf16 (!%p325_p2), %v404_v4, %v403_v2  ;;  %v1915_v8 = vpack.c.bf16 (!%p325_p2), %v623_v6, %v622_v5  ;;  %v624_v9 = vld [vmem:[%s2713_s4 + $0x10] sm:$0xff] (!%p325_p2)  ;;  %v625_v10 = vld [vmem:[%s2713_s4 + $0x18] sm:$0xff] (!%p325_p2)  ;;  %v626_v12 = vld [vmem:[%s2713_s4 + $0x20] sm:$0xff] (!%p325_p2)  ;;  %s2115_s12 = smov (!%p325_p2), 48   ;;  %s2116_s18 = smov (!%p325_p2), 32   ;;  %vm1465_vm2 = vcmask (!%p325_p2), 392192  }
   0x8   : > { %1908 = vmatprep.subr.bf16.mxu0 (!%p325_p2), %v1907_v3  ;;  %v1919_v11 = vpack.c.bf16 (!%p325_p2), %v625_v10, %v624_v9  ;;  %v627_v13 = vld [vmem:[%s2713_s4 + $0x28] sm:$0xff] (!%p325_p2)  ;;  %v628_v16 = vld [vmem:[%s2713_s4 + $0x30] sm:$0xff] (!%p325_p2)  ;;  %v629_v17 = vld [vmem:[%s2713_s4 + $0x38] sm:$0xff] (!%p325_p2)  ;;  %vm1482_vm3 = vcmask (!%p325_p2), 523264   ;;  %vm1499_vm4 = vcmask (!%p325_p2), 654336  }
   0x9   : > { %1910 = vmatpush3.bf16.msra.mxu0 (!%p325_p2), %v1907_v3  ;;  %1916 = vmatprep.subr.bf16.mxu1 (!%p325_p2), %v1915_v8  ;;  %v1923_v14 = vpack.c.bf16 (!%p325_p2), %v627_v13, %v626_v12  ;;  %v1927_v20 = vpack.c.bf16 (!%p325_p2), %v629_v17, %v628_v16  ;;  %v630_v34 = vld [vmem:[%s2713_s4 + $0x40] sm:$0xff] (!%p325_p2)  ;;  %v631_v35 = vld [vmem:[%s2713_s4 + $0x48] sm:$0xff] (!%p325_p2)  ;;  %v632_v37 = vld [vmem:[%s2713_s4 + $0x50] sm:$0xff] (!%p325_p2) }
   0xa   : > { %1912 = vmatprep.subr.bf16.mxu0 (!%p325_p2), %v1911_v7  ;;  %1918 = vmatpush3.bf16.msra.mxu1 (!%p325_p2), %v1915_v8  ;;  %v1931_v36 = vpack.c.bf16 (!%p325_p2), %v631_v35, %v630_v34  ;;  %v633_v38 = vld [vmem:[%s2713_s4 + $0x58] sm:$0xff] (!%p325_p2)  ;;  %v634_v40 = vld [vmem:[%s2713_s4 + $0x60] sm:$0xff] (!%p325_p2)  ;;  %v635_v41 = vld [vmem:[%s2713_s4 + $0x68] sm:$0xff] (!%p325_p2) }
   0xb   : > { %1920 = vmatprep.subr.bf16.mxu1 (!%p325_p2), %v1919_v11  ;;  %v1935_v39 = vpack.c.bf16 (!%p325_p2), %v633_v38, %v632_v37  ;;  %v1939_v42 = vpack.c.bf16 (!%p325_p2), %v635_v41, %v634_v40  ;;  %v636_v43 = vld [vmem:[%s2713_s4 + $0x70] sm:$0xff] (!%p325_p2)  ;;  %v637_v44 = vld [vmem:[%s2713_s4 + $0x78] sm:$0xff] (!%p325_p2)  ;;  %v2283_v46 = vld [vmem:[%s2712_s3] ss:$0 sm:$0xff] (!%p325_p2) }
   0xc   : > { %v1943_v45 = vpack.c.bf16 (!%p325_p2), %v637_v44, %v636_v43  ;;  %v2310_v34 = vld [vmem:[%s2714_s5] ss:$0 sm:$0xff] (!%p325_p2) }
   0xd   : > { %s2721_s21 = smov (!%p368_p3, %s1589_s21), 31  ;;  %1914 = vmatpush3.bf16.msra.mxu0 %v1911_v7 }
   0xe   : > { %s2210_s17 = sshll.u32 %s2721_s21, 3  ;;  %1922 = vmatpush3.bf16.msra.mxu1 %v1919_v11 }
   0xf   : > { %s2216_s20 = scalar_lea.vmem %s2709_s0, %s2210_s17  ;;  %1924 = vmatprep.subr.bf16.mxu1 %v1923_v14  ;;  %s2424_s16 = scalar_lea.vmem %s2710_s1, %s2210_s17 }
  0x10   : > { %v385_v15 = vld [vmem:[%s2216_s20] sm:$0xff]  ;;  %v386_v18 = vld [vmem:[%s2216_s20 + $0x8] sm:$0xff]  ;;  %v387_v19 = vld [vmem:[%s2216_s20 + $0x10] sm:$0xff]  ;;  %s2592_s23 = scalar_lea.vmem %s2719_s10, %s2210_s17 }
  0x11   : > { %1743 = vmatprep.mubr.msk.f32.mxu0 %vm412_vm0, %v385_v15  ;;  %v388_v21 = vld [vmem:[%s2216_s20 + $0x18] sm:$0xff]  ;;  %v389_v22 = vld [vmem:[%s2216_s20 + $0x20] sm:$0xff]  ;;  %v390_v23 = vld [vmem:[%s2216_s20 + $0x28] sm:$0xff] }
  0x12   : > { %1744 = vmatmul.mubr.msk.f32.vlgmr.msra.gmra.mrb[0].mxu0 %vm412_vm0, %v386_v18  ;;  %1926 = vmatpush3.bf16.msra.mxu1 %v1923_v14  ;;  %v391_v24 = vld [vmem:[%s2216_s20 + $0x30] sm:$0xff]  ;;  %v392_v25 = vld [vmem:[%s2216_s20 + $0x38] sm:$0xff]  ;;  %v393_v26 = vld [vmem:[%s2216_s20 + $0x40] sm:$0xff] }
  0x13   : > { %1746 = vmatprep.mubr.msk.f32.mxu0 %vm412_vm0, %v387_v19  ;;  %1928 = vmatprep.subr.bf16.mxu1 %v1927_v20  ;;  %v394_v27 = vld [vmem:[%s2216_s20 + $0x48] sm:$0xff]  ;;  %v395_v28 = vld [vmem:[%s2216_s20 + $0x50] sm:$0xff]  ;;  %v396_v29 = vld [vmem:[%s2216_s20 + $0x58] sm:$0xff] }
  0x14   : > { %v397_v30 = vld [vmem:[%s2216_s20 + $0x60] sm:$0xff]  ;;  %v398_v31 = vld [vmem:[%s2216_s20 + $0x68] sm:$0xff]  ;;  %v399_v32 = vld [vmem:[%s2216_s20 + $0x70] sm:$0xff] }
  0x15   : > { %v400_v33 = vld [vmem:[%s2216_s20 + $0x78] sm:$0xff] }
  0x16   : > { %1747 = vmatmul.mubr.msk.f32.gmra.mrb[2].mxu0 %vm412_vm0, %v388_v21  ;;  %1930 = vmatpush3.bf16.msra.mxu1 %v1927_v20 }
  0x17   : > { %1749 = vmatprep.mubr.msk.f32.mxu0 %vm412_vm0, %v389_v22  ;;  %1932 = vmatprep.subr.bf16.mxu1 %v1931_v36 }
  0x1a   : > { %1750 = vmatmul.mubr.msk.f32.gmra.mrb[4].mxu0 %vm412_vm0, %v390_v23  ;;  %1934 = vmatpush3.bf16.msra.mxu1 %v1931_v36 }
  0x1b   : > { %1752 = vmatprep.mubr.msk.f32.mxu0 %vm412_vm0, %v391_v24  ;;  %1936 = vmatprep.subr.bf16.mxu1 %v1935_v39 }
  0x1e   : > { %1753 = vmatmul.mubr.msk.f32.gmra.mrb[6].mxu0 %vm412_vm0, %v392_v25  ;;  %1938 = vmatpush3.bf16.msra.mxu1 %v1935_v39 }
  0x1f   : > { %1755 = vmatprep.mubr.msk.f32.mxu0 %vm412_vm0, %v393_v26  ;;  %1940 = vmatprep.subr.bf16.mxu1 %v1939_v42 }
  0x22   : > { %1756 = vmatmul.mubr.msk.f32.gmra.mrb[8].mxu0 %vm412_vm0, %v394_v27  ;;  %1942 = vmatpush3.bf16.msra.mxu1 %v1939_v42 }
  0x23   : > { %1758 = vmatprep.mubr.msk.f32.mxu0 %vm412_vm0, %v395_v28  ;;  %1944 = vmatprep.subr.bf16.mxu1 %v1943_v45 }
  0x26   : > { %1759 = vmatmul.mubr.msk.f32.gmra.mrb[10].mxu0 %vm412_vm0, %v396_v29  ;;  %1946 = vmatpush3.bf16.msra.mxu1 %v1943_v45 }
  0x27   : > { %1761 = vmatprep.mubr.msk.f32.mxu0 %vm412_vm0, %v397_v30 }
  0x2a   : > { %1762 = vmatmul.mubr.msk.f32.gmra.mrb[12].mxu0 %vm412_vm0, %v398_v31  ;;  %v950_v31 = vld [vmem:[%s2715_s6] sm:$0xff] }
  0x2b   : > { %1764 = vmatprep.mubr.msk.f32.mxu0 %vm412_vm0, %v399_v32  ;;  %v951_v32 = vld [vmem:[%s2715_s6 + $0x8] sm:$0xff] }
  0x2e   : > { %1765 = vmatmul.mubr.msk.f32.gmra.mrb[14].mxu0 %vm412_vm0, %v400_v33  ;;  %v1947_v33 = vpack.c.bf16 %v951_v32, %v950_v31 }
  0x30   : > { %1948 = vmatprep.subr.bf16.mxu0 %v1947_v33 }
  0x31   : > { %1950 = vmatpush3.bf16.msra.mxu0 %v1947_v33 }
  0xe5   : > { %v1745_v47 = vpop.f32.mrb[0].mxu0 }
  0xe6   : > { %v533_v48 = vadd.f32 %v1745_v47, %v2283_v46  ;;  %v527_v49 = vpop.f32.mrb[1].mxu0 }
  0xe7   : > { %v528_v50 = vadd.f32 %v2283_v46, %v527_v49 }
  0xe9   : > { %2010 = vtanh.f32 %v528_v50  ;;  %v1748_v51 = vpop.f32.mrb[2].mxu0 }
  0xea   : > { %2012 = vtanh.f32 %v533_v48  ;;  %v543_v52 = vadd.f32 %v1748_v51, %v2283_v46  ;;  %v537_v53 = vpop.f32.mrb[3].mxu0 }
  0xeb   : > { %v538_v54 = vadd.f32 %v2283_v46, %v537_v53 }
  0xed   : > { %2014 = vtanh.f32 %v538_v54  ;;  %v1751_v55 = vpop.f32.mrb[4].mxu0 }
  0xee   : > { %2016 = vtanh.f32 %v543_v52  ;;  %v553_v56 = vadd.f32 %v1751_v55, %v2283_v46  ;;  %v547_v57 = vpop.f32.mrb[5].mxu0 }
  0xef   : > { %v548_v58 = vadd.f32 %v2283_v46, %v547_v57 }
  0xf0   : > { %2018 = vtanh.f32 %v553_v56 }
  0xf1   : > { %2020 = vtanh.f32 %v548_v58  ;;  %v1754_v59 = vpop.f32.mrb[6].mxu0 }
  0xf2   : > { %v563_v60 = vadd.f32 %v1754_v59, %v2283_v46  ;;  %v557_v61 = vpop.f32.mrb[7].mxu0 }
  0xf3   : > { %v2011_v62 = vpop.eup %2010  ;;  %v558_v63 = vadd.f32 %v2283_v46, %v557_v61 }
  0xf4   : > { %v2013_v0 = vpop.eup %2012  ;;  %2022 = vtanh.f32 %v563_v60  ;;  %1799 = vmatprep.mubr.f32.mxu1 %v2011_v62 }
  0xf5   : > { %2024 = vtanh.f32 %v558_v63  ;;  %v1757_v1 = vpop.f32.mrb[8].mxu0  ;;  %1800 = vmatmul.mubr.f32.vlgmr.msra.gmra.mrb[0].mxu1 %v2013_v0 }
  0xf6   : > { %v573_v2 = vadd.f32 %v1757_v1, %v2283_v46  ;;  %v567_v3 = vpop.f32.mrb[9].mxu0 }
  0xf7   : > { %v2015_v4 = vpop.eup %2014  ;;  %v568_v5 = vadd.f32 %v2283_v46, %v567_v3 }
  0xf8   : > { %v2017_v6 = vpop.eup %2016  ;;  %2026 = vtanh.f32 %v573_v2  ;;  %1802 = vmatprep.mubr.f32.mxu1 %v2015_v4 }
  0xf9   : > { %2028 = vtanh.f32 %v568_v5  ;;  %v1760_v7 = vpop.f32.mrb[10].mxu0  ;;  %1803 = vmatmul.mubr.f32.gmra.mrb[2].mxu1 %v2017_v6 }
  0xfa   : > { %v2019_v8 = vpop.eup %2018  ;;  %v583_v9 = vadd.f32 %v1760_v7, %v2283_v46  ;;  %v577_v10 = vpop.f32.mrb[11].mxu0 }
  0xfb   : > { %v2021_v11 = vpop.eup %2020  ;;  %v578_v12 = vadd.f32 %v2283_v46, %v577_v10 }
  0xfc   : > { %2030 = vtanh.f32 %v583_v9  ;;  %1805 = vmatprep.mubr.f32.mxu1 %v2021_v11 }
  0xfd   : > { %2032 = vtanh.f32 %v578_v12  ;;  %v1763_v13 = vpop.f32.mrb[12].mxu0  ;;  %1806 = vmatmul.mubr.f32.gmra.mrb[4].mxu1 %v2019_v8 }
  0xfe   : > { %v2023_v14 = vpop.eup %2022  ;;  %v593_v15 = vadd.f32 %v1763_v13, %v2283_v46  ;;  %v587_v16 = vpop.f32.mrb[13].mxu0 }
  0xff   : > { %v2025_v17 = vpop.eup %2024  ;;  %v588_v18 = vadd.f32 %v2283_v46, %v587_v16 }
 0x100   : > { %2034 = vtanh.f32 %v593_v15  ;;  %1808 = vmatprep.mubr.f32.mxu1 %v2025_v17 }
 0x101   : > { %2036 = vtanh.f32 %v588_v18  ;;  %v1766_v19 = vpop.f32.mrb[14].mxu0  ;;  %1809 = vmatmul.mubr.f32.gmra.mrb[6].mxu1 %v2023_v14 }
 0x102   : > { %v2027_v20 = vpop.eup %2026  ;;  %v603_v21 = vadd.f32 %v1766_v19, %v2283_v46  ;;  %v597_v22 = vpop.f32.mrb[15].mxu0 }
 0x103   : > { %v2029_v23 = vpop.eup %2028  ;;  %v598_v24 = vadd.f32 %v2283_v46, %v597_v22 }
 0x104   : > { %2038 = vtanh.f32 %v603_v21  ;;  %1811 = vmatprep.mubr.f32.mxu1 %v2029_v23 }
 0x105   : > { %2040 = vtanh.f32 %v598_v24  ;;  %1812 = vmatmul.mubr.f32.gmra.mrb[8].mxu1 %v2027_v20 }
 0x106   : > { %v2031_v25 = vpop.eup %2030 }
 0x107   : > { %v2033_v26 = vpop.eup %2032 }
 0x108   : > { %1814 = vmatprep.mubr.f32.mxu1 %v2033_v26 }
 0x109   : > { %1815 = vmatmul.mubr.f32.gmra.mrb[10].mxu1 %v2031_v25 }
 0x10a   : > { %v2035_v27 = vpop.eup %2034 }
 0x10b   : > { %v2037_v28 = vpop.eup %2036 }
 0x10c   : > { %1817 = vmatprep.mubr.f32.mxu1 %v2037_v28 }
 0x10d   : > { %1818 = vmatmul.mubr.f32.gmra.mrb[12].mxu1 %v2035_v27 }
 0x10e   : > { %v2039_v29 = vpop.eup %2038 }
 0x10f   : > { %v2041_v30 = vpop.eup %2040 }
 0x110   : > { %1820 = vmatprep.mubr.f32.mxu1 %v2041_v30 }
 0x111   : > { %1821 = vmatmul.mubr.f32.gmra.mrb[14].mxu1 %v2039_v29 }
 0x1c8   : > { %v1801_v35 = vpop.f32.mrb[0].mxu1 }
 0x1c9   : > { %v2313_v36 = vadd.f32 %v1801_v35, %v2310_v34  ;;  %v711_v37 = vpop.f32.mrb[1].mxu1 }
 0x1ca   : > { %v2316_v38 = vadd.f32 %v2310_v34, %v711_v37 }
 0x1cb   : > { %v807_v39 = vmul.f32 0.5, %v2313_v36 }
 0x1cc   : > { %v806_v40 = vmul.f32 0.5, %v2316_v38  ;;  %v1804_v41 = vpop.f32.mrb[2].mxu1 }
 0x1cd   : > { %v2321_v42 = vadd.f32 %v1804_v41, %v2310_v34  ;;  %v721_v43 = vpop.f32.mrb[3].mxu1  ;;  %v824_v46 = vmul.f32 1.442695, %v807_v39 }
 0x1ce   : > { %v822_v44 = vmul.f32 1.442695, %v806_v40  ;;  %v2324_v45 = vadd.f32 %v2310_v34, %v721_v43 }
 0x1cf   : > { %v809_v47 = vmul.f32 0.5, %v2321_v42 }
 0x1d0   : > { %2042 = vpow2.f32 %v822_v44  ;;  %v808_v48 = vmul.f32 0.5, %v2324_v45  ;;  %v1807_v49 = vpop.f32.mrb[4].mxu1 }
 0x1d1   : > { %v2329_v50 = vadd.f32 %v1807_v49, %v2310_v34  ;;  %v731_v51 = vpop.f32.mrb[5].mxu1  ;;  %2044 = vpow2.f32 %v824_v46  ;;  %v828_v54 = vmul.f32 1.442695, %v809_v47 }
 0x1d2   : > { %v826_v52 = vmul.f32 1.442695, %v808_v48  ;;  %v2332_v53 = vadd.f32 %v2310_v34, %v731_v51 }
 0x1d3   : > { %v811_v55 = vmul.f32 0.5, %v2329_v50 }
 0x1d4   : > { %2046 = vpow2.f32 %v826_v52  ;;  %v810_v56 = vmul.f32 0.5, %v2332_v53  ;;  %v1810_v57 = vpop.f32.mrb[6].mxu1 }
 0x1d5   : > { %v2337_v58 = vadd.f32 %v1810_v57, %v2310_v34  ;;  %v741_v59 = vpop.f32.mrb[7].mxu1  ;;  %2048 = vpow2.f32 %v828_v54  ;;  %v832_v62 = vmul.f32 1.442695, %v811_v55  ;;  %v790_v57 = vld [vmem:[%s2424_s16] sm:$0xff] }
 0x1d6   : > { %v830_v60 = vmul.f32 1.442695, %v810_v56  ;;  %v2340_v61 = vadd.f32 %v2310_v34, %v741_v59 }
 0x1d7   : > { %v813_v63 = vmul.f32 0.5, %v2337_v58 }
 0x1d8   : > { %2050 = vpow2.f32 %v830_v60  ;;  %v812_v0 = vmul.f32 0.5, %v2340_v61  ;;  %v1813_v1 = vpop.f32.mrb[8].mxu1 }
 0x1d9   : > { %v2345_v2 = vadd.f32 %v1813_v1, %v2310_v34  ;;  %v751_v3 = vpop.f32.mrb[9].mxu1  ;;  %2052 = vpow2.f32 %v832_v62  ;;  %v836_v7 = vmul.f32 1.442695, %v813_v63  ;;  %v792_v62 = vld [vmem:[%s2424_s16 + $0x10] sm:$0xff]  ;;  %v791_v63 = vld [vmem:[%s2424_s16 + $0x8] sm:$0xff] }
 0x1da   : > { %v2043_v4 = vpop.eup %2042  ;;  %v834_v5 = vmul.f32 1.442695, %v812_v0  ;;  %v2348_v6 = vadd.f32 %v2310_v34, %v751_v3 }
 0x1db   : > { %v815_v8 = vmul.f32 0.5, %v2345_v2  ;;  %870 = vrot.lane.b32.xlu0 %v2043_v4, %s2114_s11  ;;  %v2045_v11 = vpop.eup %2044 }
 0x1dc   : > { %2054 = vpow2.f32 %v834_v5  ;;  %v814_v9 = vmul.f32 0.5, %v2348_v6  ;;  %v1816_v10 = vpop.f32.mrb[10].mxu1 }
 0x1dd   : > { %v2354_v12 = vadd.f32 %v1816_v10, %v2310_v34  ;;  %v761_v13 = vpop.f32.mrb[11].mxu1  ;;  %2056 = vpow2.f32 %v836_v7  ;;  %v840_v17 = vmul.f32 1.442695, %v815_v8  ;;  %v793_v7 = vld [vmem:[%s2424_s16 + $0x18] sm:$0xff]  ;;  %v794_v8 = vld [vmem:[%s2424_s16 + $0x20] sm:$0xff] }
 0x1de   : > { %v2047_v14 = vpop.eup %2046  ;;  %v838_v15 = vmul.f32 1.442695, %v814_v9  ;;  %v2357_v16 = vadd.f32 %v2310_v34, %v761_v13 }
 0x1df   : > { %v817_v18 = vmul.f32 0.5, %v2354_v12  ;;  %874 = vrot.lane.b32.xlu1 %v2047_v14, %s2114_s11  ;;  %872 = vrot.lane.b32.xlu0 %v2045_v11, %s2114_s11  ;;  %v2049_v21 = vpop.eup %2048 }
 0x1e0   : > { %2058 = vpow2.f32 %v838_v15  ;;  %v816_v19 = vmul.f32 0.5, %v2357_v16  ;;  %v1819_v20 = vpop.f32.mrb[12].mxu1  ;;  %v795_v15 = vld [vmem:[%s2424_s16 + $0x28] sm:$0xff] }
 0x1e1   : > { %v2364_v22 = vadd.f32 %v1819_v20, %v2310_v34  ;;  %v771_v23 = vpop.f32.mrb[13].mxu1  ;;  %2060 = vpow2.f32 %v840_v17  ;;  %v844_v27 = vmul.f32 1.442695, %v817_v18  ;;  %v796_v17 = vld [vmem:[%s2424_s16 + $0x30] sm:$0xff] }
 0x1e2   : > { %v2051_v24 = vpop.eup %2050  ;;  %v842_v25 = vmul.f32 1.442695, %v816_v19  ;;  %v2367_v26 = vadd.f32 %v2310_v34, %v771_v23  ;;  %v797_v23 = vld [vmem:[%s2424_s16 + $0x38] sm:$0xff] }
 0x1e3   : > { %v819_v28 = vmul.f32 0.5, %v2364_v22  ;;  %876 = vrot.lane.b32.xlu1 %v2049_v21, %s2114_s11  ;;  %878 = vrot.lane.b32.xlu0 %v2051_v24, %s2114_s11  ;;  %v2053_v31 = vpop.eup %2052  ;;  %v798_v24 = vld [vmem:[%s2424_s16 + $0x40] sm:$0xff] }
 0x1e4   : > { %2062 = vpow2.f32 %v842_v25  ;;  %v818_v29 = vmul.f32 0.5, %v2367_v26  ;;  %v1822_v30 = vpop.f32.mrb[14].mxu1 }
 0x1e5   : > { %v2374_v32 = vadd.f32 %v1822_v30, %v2310_v34  ;;  %v781_v33 = vpop.f32.mrb[15].mxu1  ;;  %2064 = vpow2.f32 %v844_v27  ;;  %v848_v40 = vmul.f32 1.442695, %v819_v28  ;;  %v799_v30 = vld [vmem:[%s2424_s16 + $0x48] sm:$0xff] }
 0x1e6   : > { %v2055_v35 = vpop.eup %2054  ;;  %v846_v37 = vmul.f32 1.442695, %v818_v29  ;;  %v2377_v39 = vadd.f32 %v2310_v34, %v781_v33 }
 0x1e7   : > { %880 = vrot.lane.b32.xlu1 %v2053_v31, %s2114_s11  ;;  %882 = vrot.lane.b32.xlu0 %v2055_v35, %s2114_s11  ;;  %v821_v41 = vmul.f32 0.5, %v2374_v32  ;;  %v2057_v44 = vpop.eup %2056  ;;  %v800_v31 = vld [vmem:[%s2424_s16 + $0x50] sm:$0xff] }
 0x1e8   : > { %2066 = vpow2.f32 %v846_v37  ;;  %v820_v43 = vmul.f32 0.5, %v2377_v39 }
 0x1e9   : > { %2068 = vpow2.f32 %v848_v40  ;;  %v852_v34 = vmul.f32 1.442695, %v821_v41  ;;  %v801_v41 = vld [vmem:[%s2424_s16 + $0x58] sm:$0xff] }
 0x1ea   : > { %v2059_v46 = vpop.eup %2058  ;;  %v850_v47 = vmul.f32 1.442695, %v820_v43  ;;  %v802_v43 = vld [vmem:[%s2424_s16 + $0x60] sm:$0xff] }
 0x1eb   : > { %884 = vrot.lane.b32.xlu1 %v2057_v44, %s2114_s11  ;;  %886 = vrot.lane.b32.xlu0 %v2059_v46, %s2114_s11  ;;  %v2061_v48 = vpop.eup %2060 }
 0x1ec   : > { %2070 = vpow2.f32 %v850_v47 }
 0x1ed   : > { %2072 = vpow2.f32 %v852_v34 }
 0x1ee   : > { %v2063_v49 = vpop.eup %2062 }
 0x1ef   : > { %888 = vrot.lane.b32.xlu1 %v2061_v48, %s2114_s11  ;;  %890 = vrot.lane.b32.xlu0 %v2063_v49, %s2114_s11  ;;  %v2065_v51 = vpop.eup %2064  ;;  %v803_v48 = vld [vmem:[%s2424_s16 + $0x68] sm:$0xff]  ;;  %v804_v49 = vld [vmem:[%s2424_s16 + $0x70] sm:$0xff] }
 0x1f2   : > { %v2067_v52 = vpop.eup %2066 }
 0x1f3   : > { %892 = vrot.lane.b32.xlu1 %v2065_v51, %s2114_s11  ;;  %894 = vrot.lane.b32.xlu0 %v2067_v52, %s2114_s11  ;;  %v2069_v54 = vpop.eup %2068  ;;  %v1170_v52 = vld [vmem:[%s2717_s8 + $0x8] sm:$0xff] }
 0x1f6   : > { %v2071_v55 = vpop.eup %2070 }
 0x1f7   : > { %896 = vrot.lane.b32.xlu1 %v2069_v54, %s2114_s11  ;;  %898 = vrot.lane.b32.xlu0 %v2071_v55, %s2114_s11  ;;  %v2073_v56 = vpop.eup %2072  ;;  %v1171_v54 = vld [vmem:[%s2717_s8 + $0x10] sm:$0xff] }
 0x1fb   : > { %900 = vrot.lane.b32.xlu1 %v2073_v56, %s2114_s11  ;;  %1401 = vrot.lane.b32.xlu0 %v2316_v38, %s2115_s12 }
 0x1ff   : > { %1403 = vrot.lane.b32.xlu1 %v2313_v36, %s2115_s12  ;;  %1405 = vrot.lane.b32.xlu0 %v2324_v45, %s2115_s12 }
 0x203   : > { %1407 = vrot.lane.b32.xlu1 %v2321_v42, %s2115_s12  ;;  %1409 = vrot.lane.b32.xlu0 %v2332_v53, %s2115_s12 }
 0x207   : > { %1411 = vrot.lane.b32.xlu1 %v2329_v50, %s2115_s12  ;;  %1413 = vrot.lane.b32.xlu0 %v2340_v61, %s2115_s12 }
 0x20b   : > { %1415 = vrot.lane.b32.xlu1 %v2337_v58, %s2115_s12  ;;  %1417 = vrot.lane.b32.xlu0 %v2348_v6, %s2115_s12 }
 0x20f   : > { %1419 = vrot.lane.b32.xlu1 %v2345_v2, %s2115_s12  ;;  %1421 = vrot.lane.b32.xlu0 %v2357_v16, %s2115_s12 }
 0x213   : > { %1423 = vrot.lane.b32.xlu1 %v2354_v12, %s2115_s12  ;;  %1425 = vrot.lane.b32.xlu0 %v2367_v26, %s2115_s12 }
 0x217   : > { %1427 = vrot.lane.b32.xlu1 %v2364_v22, %s2115_s12 }
 0x24d   : > { %v871_v59 = vpop.permute.xlu0 %870 }
 0x24e   : > { %v918_v60 = vmul.f32 %v871_v59, %v790_v57 }
 0x250   : > { %v934_v0 = vadd.f32 %v918_v60, %v2316_v38 }
 0x251   : > { %v875_v1 = vpop.permute.xlu1 %874  ;;  %v873_v3 = vpop.permute.xlu0 %872 }
 0x252   : > { %v920_v4 = vmul.f32 %v875_v1, %v792_v62  ;;  %v919_v5 = vmul.f32 %v873_v3, %v791_v63  ;;  %1337 = vrot.lane.b32.xlu0 %v934_v0, %s2116_s18  ;;  %1827 = vmatprep.mubr.msk.f32.mxu0 %vm959_vm1, %v934_v0  ;;  %v1173_v62 = vld [vmem:[%s2717_s8 + $0x20] sm:$0xff]  ;;  %v1174_v63 = vld [vmem:[%s2717_s8 + $0x28] sm:$0xff]  ;;  %v805_v0 = vld [vmem:[%s2424_s16 + $0x78] sm:$0xff] }
 0x254   : > { %v936_v9 = vadd.f32 %v920_v4, %v2324_v45  ;;  %v935_v10 = vadd.f32 %v919_v5, %v2313_v36  ;;  %v1959_v5 = vpack.c.bf16 %v1174_v63, %v1173_v62 }
 0x255   : > { %v877_v11 = vpop.permute.xlu1 %876  ;;  %v879_v13 = vpop.permute.xlu0 %878 }
 0x256   : > { %v921_v38 = vmul.f32 %v877_v11, %v793_v7  ;;  %v922_v14 = vmul.f32 %v879_v13, %v794_v8  ;;  %1341 = vrot.lane.b32.xlu0 %v936_v9, %s2116_s18  ;;  %1339 = vrot.lane.b32.xlu1 %v935_v10, %s2116_s18  ;;  %v1175_v8 = vld [vmem:[%s2717_s8 + $0x30] sm:$0xff]  ;;  %v1177_v11 = vld [vmem:[%s2717_s8 + $0x40] sm:$0xff] }
 0x257   : > { %1828 = vmatmul.mubr.msk.f32.vlgmr.msra.gmra.mrb[16].mxu0 %vm959_vm1, %v935_v10 }
 0x258   : > { %v937_v18 = vadd.f32 %v921_v38, %v2321_v42  ;;  %v938_v45 = vadd.f32 %v922_v14, %v2332_v53  ;;  %1830 = vmatprep.mubr.msk.f32.mxu0 %vm959_vm1, %v936_v9  ;;  %v1180_v38 = vld [vmem:[%s2717_s8 + $0x58] sm:$0xff] }
 0x259   : > { %v881_v36 = vpop.permute.xlu1 %880  ;;  %v883_v19 = vpop.permute.xlu0 %882 }
 0x25a   : > { %v923_v20 = vmul.f32 %v881_v36, %v795_v15  ;;  %v924_v21 = vmul.f32 %v883_v19, %v796_v17  ;;  %1343 = vrot.lane.b32.xlu1 %v937_v18, %s2116_s18  ;;  %1345 = vrot.lane.b32.xlu0 %v938_v45, %s2116_s18  ;;  %v1181_v15 = vld [vmem:[%s2717_s8 + $0x60] sm:$0xff]  ;;  %v1182_v17 = vld [vmem:[%s2717_s8 + $0x68] sm:$0xff] }
 0x25b   : > { %1831 = vmatmul.mubr.msk.f32.gmra.mrb[18].mxu0 %vm959_vm1, %v937_v18  ;;  %v1975_v18 = vpack.c.bf16 %v1182_v17, %v1181_v15  ;;  %v1184_v36 = vld [vmem:[%s2717_s8 + $0x78] sm:$0xff] }
 0x25c   : > { %v939_v42 = vadd.f32 %v923_v20, %v2329_v50  ;;  %v940_v53 = vadd.f32 %v924_v21, %v2340_v61  ;;  %1833 = vmatprep.mubr.msk.f32.mxu0 %vm959_vm1, %v938_v45  ;;  %v1183_v45 = vld [vmem:[%s2717_s8 + $0x70] sm:$0xff]  ;;  %v2545_v20 = vld [vmem:[%s2716_s7] ss:$0 sm:$0xff] }
 0x25d   : > { %v885_v25 = vpop.permute.xlu1 %884  ;;  %v887_v27 = vpop.permute.xlu0 %886  ;;  %v1979_v19 = vpack.c.bf16 %v1184_v36, %v1183_v45 }
 0x25e   : > { %v925_v28 = vmul.f32 %v885_v25, %v797_v23  ;;  %v926_v29 = vmul.f32 %v887_v27, %v798_v24  ;;  %1347 = vrot.lane.b32.xlu1 %v939_v42, %s2116_s18  ;;  %1349 = vrot.lane.b32.xlu0 %v940_v53, %s2116_s18 }
 0x25f   : > { %1834 = vmatmul.mubr.msk.f32.gmra.mrb[20].mxu0 %vm959_vm1, %v939_v42 }
 0x260   : > { %v941_v50 = vadd.f32 %v925_v28, %v2337_v58  ;;  %v942_v61 = vadd.f32 %v926_v29, %v2348_v6  ;;  %1836 = vmatprep.mubr.msk.f32.mxu0 %vm959_vm1, %v940_v53 }
 0x261   : > { %v889_v33 = vpop.permute.xlu1 %888  ;;  %v891_v35 = vpop.permute.xlu0 %890 }
 0x262   : > { %v927_v37 = vmul.f32 %v889_v33, %v799_v30  ;;  %v928_v40 = vmul.f32 %v891_v35, %v800_v31  ;;  %1351 = vrot.lane.b32.xlu1 %v941_v50, %s2116_s18  ;;  %1353 = vrot.lane.b32.xlu0 %v942_v61, %s2116_s18 }
 0x263   : > { %1837 = vmatmul.mubr.msk.f32.gmra.mrb[22].mxu0 %vm959_vm1, %v941_v50 }
 0x264   : > { %v943_v58 = vadd.f32 %v927_v37, %v2345_v2  ;;  %v944_v6 = vadd.f32 %v928_v40, %v2357_v16  ;;  %1839 = vmatprep.mubr.msk.f32.mxu0 %vm959_vm1, %v942_v61  ;;  %v1169_v16 = vld [vmem:[%s2717_s8] sm:$0xff] }
 0x265   : > { %v893_v44 = vpop.permute.xlu1 %892  ;;  %v895_v46 = vpop.permute.xlu0 %894 }
 0x266   : > { %v929_v47 = vmul.f32 %v893_v44, %v801_v41  ;;  %v930_v34 = vmul.f32 %v895_v46, %v802_v43  ;;  %1355 = vrot.lane.b32.xlu1 %v943_v58, %s2116_s18  ;;  %1357 = vrot.lane.b32.xlu0 %v944_v6, %s2116_s18 }
 0x267   : > { %1840 = vmatmul.mubr.msk.f32.gmra.mrb[24].mxu0 %vm959_vm1, %v943_v58 }
 0x268   : > { %v945_v51 = vadd.f32 %v929_v47, %v2354_v12  ;;  %v946_v2 = vadd.f32 %v930_v34, %v2367_v26  ;;  %1842 = vmatprep.mubr.msk.f32.mxu0 %vm959_vm1, %v944_v6  ;;  %v1951_v12 = vpack.c.bf16 %v1170_v52, %v1169_v16  ;;  %v1172_v26 = vld [vmem:[%s2717_s8 + $0x18] sm:$0xff] }
 0x269   : > { %v897_v55 = vpop.permute.xlu1 %896  ;;  %v899_v56 = vpop.permute.xlu0 %898  ;;  %v1955_v60 = vpack.c.bf16 %v1172_v26, %v1171_v54 }
 0x26a   : > { %v931_v57 = vmul.f32 %v897_v55, %v803_v48  ;;  %v932_v59 = vmul.f32 %v899_v56, %v804_v49  ;;  %1359 = vrot.lane.b32.xlu1 %v945_v51, %s2116_s18  ;;  %1361 = vrot.lane.b32.xlu0 %v946_v2, %s2116_s18 }
 0x26b   : > { %1843 = vmatmul.mubr.msk.f32.gmra.mrb[26].mxu0 %vm959_vm1, %v945_v51  ;;  %1952 = vmatprep.subr.bf16.mxu0 %v1951_v12 }
 0x26c   : > { %v947_v1 = vadd.f32 %v931_v57, %v2364_v22  ;;  %v948_v3 = vadd.f32 %v932_v59, %v2377_v39  ;;  %1845 = vmatprep.mubr.msk.f32.mxu0 %vm959_vm1, %v946_v2  ;;  %1954 = vmatpush3.bf16.msra.mxu0 %v1951_v12  ;;  %v1176_v22 = vld [vmem:[%s2717_s8 + $0x38] sm:$0xff] }
 0x26d   : > { %v901_v4 = vpop.permute.xlu1 %900  ;;  %1956 = vmatprep.subr.bf16.mxu0 %v1955_v60  ;;  %1983 = vmatprep.subr.bf16.mxu1 %v1951_v12  ;;  %v1963_v10 = vpack.c.bf16 %v1176_v22, %v1175_v8 }
 0x26e   : > { %v933_v7 = vmul.f32 %v901_v4, %v805_v0  ;;  %1363 = vrot.lane.b32.xlu1 %v947_v1, %s2116_s18  ;;  %1365 = vrot.lane.b32.xlu0 %v948_v3, %s2116_s18 }
 0x26f   : > { %1846 = vmatmul.mubr.msk.f32.gmra.mrb[28].mxu0 %vm959_vm1, %v947_v1  ;;  %1991 = vmatpush3.bf16.msra.mxu1 %v1951_v12 }
 0x270   : > { %v949_v9 = vadd.f32 %v933_v7, %v2374_v32  ;;  %1848 = vmatprep.mubr.msk.f32.mxu0 %vm959_vm1, %v948_v3  ;;  %1958 = vmatpush3.bf16.msra.mxu0 %v1955_v60 }
 0x271   : > { %1960 = vmatprep.subr.bf16.mxu0 %v1959_v5  ;;  %1984 = vmatprep.subr.bf16.mxu1 %v1955_v60  ;;  %v1404_v22 = vpop.permute.xlu1 %1403 }
 0x272   : > { %1367 = vrot.lane.b32.xlu1 %v949_v9, %s2116_s18  ;;  %1429 = vrot.lane.b32.xlu0 %v2377_v39, %s2115_s12  ;;  %v1178_v39 = vld [vmem:[%s2717_s8 + $0x48] sm:$0xff] }
 0x273   : > { %1849 = vmatmul.mubr.msk.f32.gmra.mrb[30].mxu0 %vm959_vm1, %v949_v9  ;;  %1992 = vmatpush3.bf16.msra.mxu1 %v1955_v60  ;;  %v1967_v13 = vpack.c.bf16 %v1178_v39, %v1177_v11  ;;  %v1402_v9 = vpop.permute.xlu0 %1401 }
 0x274   : > { %1962 = vmatpush3.bf16.msra.mxu0 %v1959_v5  ;;  %1985 = vmatprep.subr.bf16.mxu1 %v1959_v5 }
 0x275   : > { %1964 = vmatprep.subr.bf16.mxu0 %v1963_v10 }
 0x276   : > { %1431 = vrot.lane.b32.xlu1 %v2374_v32, %s2115_s12  ;;  %v1179_v32 = vld [vmem:[%s2717_s8 + $0x50] sm:$0xff] }
 0x277   : > { %1993 = vmatpush3.bf16.msra.mxu1 %v1959_v5  ;;  %v1971_v14 = vpack.c.bf16 %v1180_v38, %v1179_v32  ;;  %v1406_v11 = vpop.permute.xlu0 %1405 }
 0x278   : > { %1966 = vmatpush3.bf16.msra.mxu0 %v1963_v10  ;;  %1986 = vmatprep.subr.bf16.mxu1 %v1963_v10 }
 0x279   : > { %1968 = vmatprep.subr.bf16.mxu0 %v1967_v13 }
 0x27b   : > { %1994 = vmatpush3.bf16.msra.mxu1 %v1963_v10  ;;  %v1408_v10 = vpop.permute.xlu1 %1407 }
 0x27c   : > { %1987 = vmatprep.subr.bf16.mxu1 %v1967_v13  ;;  %1970 = vmatpush3.bf16.msra.mxu0 %v1967_v13 }
 0x27d   : > { %1972 = vmatprep.subr.bf16.mxu0 %v1971_v14 }
 0x27f   : > { %1995 = vmatpush3.bf16.msra.mxu1 %v1967_v13  ;;  %v1412_v39 = vpop.permute.xlu1 %1411  ;;  %v2563_v13 = vpop.permute.xlu0 %1409 }
 0x280   : > { %1988 = vmatprep.subr.bf16.mxu1 %v1971_v14  ;;  %1974 = vmatpush3.bf16.msra.mxu0 %v1971_v14 }
 0x281   : > { %1976 = vmatprep.subr.bf16.mxu0 %v1975_v18 }
 0x283   : > { %1996 = vmatpush3.bf16.msra.mxu1 %v1971_v14  ;;  %v2565_v32 = vpop.permute.xlu1 %1415  ;;  %v2567_v38 = vpop.permute.xlu0 %1413 }
 0x284   : > { %1989 = vmatprep.subr.bf16.mxu1 %v1975_v18  ;;  %1978 = vmatpush3.bf16.msra.mxu0 %v1975_v18 }
 0x285   : > { %1980 = vmatprep.subr.bf16.mxu0 %v1979_v19 }
 0x287   : > { %1997 = vmatpush3.bf16.msra.mxu1 %v1975_v18  ;;  %v2569_v14 = vpop.permute.xlu1 %1419  ;;  %v2571_v15 = vpop.permute.xlu0 %1417 }
 0x288   : > { %1990 = vmatprep.subr.bf16.mxu1 %v1979_v19  ;;  %1982 = vmatpush3.bf16.msra.mxu0 %v1979_v19 }
 0x28b   : > { %1998 = vmatpush3.bf16.msra.mxu1 %v1979_v19  ;;  %v2573_v17 = vpop.permute.xlu1 %1423  ;;  %v2575_v18 = vpop.permute.xlu0 %1421 }
 0x28f   : > { %v2577_v45 = vpop.permute.xlu1 %1427  ;;  %v2579_v36 = vpop.permute.xlu0 %1425 }
 0x2c8   : > { %v1340_v19 = vpop.permute.xlu1 %1339 }
 0x32a   : > { %v1829_v21 = vpop.f32.mrb[16].mxu0 }
 0x32b   : > { %v1080_v23 = vadd.f32 %v1829_v21, %v2545_v20  ;;  %v1074_v24 = vpop.f32.mrb[17].mxu0  ;;  %v1344_v21 = vpop.permute.xlu1 %1343 }
 0x32c   : > { %v1075_v42 = vadd.f32 %v2545_v20, %v1074_v24 }
 0x32e   : > { %2074 = vtanh.f32 %v1075_v42  ;;  %v1832_v53 = vpop.f32.mrb[18].mxu0 }
 0x32f   : > { %2076 = vtanh.f32 %v1080_v23  ;;  %v1090_v25 = vadd.f32 %v1832_v53, %v2545_v20  ;;  %v1084_v27 = vpop.f32.mrb[19].mxu0  ;;  %v1348_v24 = vpop.permute.xlu1 %1347  ;;  %v2584_v53 = vld [vmem:[%s2718_s9] ss:$0 sm:$0xff] }
 0x330   : > { %v1085_v28 = vadd.f32 %v2545_v20, %v1084_v27 }
 0x332   : > { %2078 = vtanh.f32 %v1085_v28  ;;  %v1835_v29 = vpop.f32.mrb[20].mxu0 }
 0x333   : > { %2080 = vtanh.f32 %v1090_v25  ;;  %v1100_v30 = vadd.f32 %v1835_v29, %v2545_v20  ;;  %v1094_v31 = vpop.f32.mrb[21].mxu0  ;;  %v1352_v27 = vpop.permute.xlu1 %1351 }
 0x334   : > { %v1095_v50 = vadd.f32 %v2545_v20, %v1094_v31 }
 0x336   : > { %2082 = vtanh.f32 %v1095_v50  ;;  %v1838_v61 = vpop.f32.mrb[22].mxu0 }
 0x337   : > { %2084 = vtanh.f32 %v1100_v30  ;;  %v1110_v33 = vadd.f32 %v1838_v61, %v2545_v20  ;;  %v1104_v35 = vpop.f32.mrb[23].mxu0 }
 0x338   : > { %v2075_v37 = vpop.eup %2074  ;;  %v1105_v40 = vadd.f32 %v2545_v20, %v1104_v35 }
 0x339   : > { %v2077_v41 = vpop.eup %2076  ;;  %1883 = vmatprep.mubr.f32.mxu0 %v2075_v37 }
 0x33a   : > { %2086 = vtanh.f32 %v1105_v40  ;;  %v1841_v43 = vpop.f32.mrb[24].mxu0  ;;  %1884 = vmatmul.mubr.f32.vlgmr.msra.gmra.mrb[32].mxu0 %v2077_v41 }
 0x33b   : > { %2088 = vtanh.f32 %v1110_v33  ;;  %v1120_v58 = vadd.f32 %v1841_v43, %v2545_v20  ;;  %v1114_v6 = vpop.f32.mrb[25].mxu0 }
 0x33c   : > { %v2079_v44 = vpop.eup %2078  ;;  %v1115_v46 = vadd.f32 %v2545_v20, %v1114_v6 }
 0x33d   : > { %v2081_v47 = vpop.eup %2080  ;;  %1886 = vmatprep.mubr.f32.mxu0 %v2079_v44  ;;  %v1356_v44 = vpop.permute.xlu1 %1355 }
 0x33e   : > { %2090 = vtanh.f32 %v1115_v46  ;;  %v1844_v34 = vpop.f32.mrb[26].mxu0  ;;  %1887 = vmatmul.mubr.f32.gmra.mrb[34].mxu0 %v2081_v47 }
 0x33f   : > { %2092 = vtanh.f32 %v1120_v58  ;;  %v1130_v48 = vadd.f32 %v1844_v34, %v2545_v20  ;;  %v1124_v49 = vpop.f32.mrb[27].mxu0 }
 0x340   : > { %v2083_v51 = vpop.eup %2082  ;;  %v1125_v2 = vadd.f32 %v2545_v20, %v1124_v49 }
 0x341   : > { %v2085_v16 = vpop.eup %2084  ;;  %1889 = vmatprep.mubr.f32.mxu0 %v2083_v51 }
 0x342   : > { %2094 = vtanh.f32 %v1125_v2  ;;  %v1847_v52 = vpop.f32.mrb[28].mxu0  ;;  %1890 = vmatmul.mubr.f32.gmra.mrb[36].mxu0 %v2085_v16 }
 0x343   : > { %2096 = vtanh.f32 %v1130_v48  ;;  %v1140_v54 = vadd.f32 %v1847_v52, %v2545_v20  ;;  %v1134_v55 = vpop.f32.mrb[29].mxu0 }
 0x344   : > { %v2087_v56 = vpop.eup %2086  ;;  %v1135_v12 = vadd.f32 %v2545_v20, %v1134_v55 }
 0x345   : > { %v2089_v26 = vpop.eup %2088  ;;  %1892 = vmatprep.mubr.f32.mxu1 %v2087_v56 }
 0x346   : > { %2098 = vtanh.f32 %v1135_v12  ;;  %v1850_v57 = vpop.f32.mrb[30].mxu0  ;;  %1893 = vmatmul.mubr.f32.vlgmr.msra.gmra.mrb[16].mxu1 %v2089_v26 }
 0x347   : > { %2100 = vtanh.f32 %v1140_v54  ;;  %v1150_v59 = vadd.f32 %v1850_v57, %v2545_v20  ;;  %v1144_v60 = vpop.f32.mrb[31].mxu0 }
 0x348   : > { %v2091_v62 = vpop.eup %2090  ;;  %v1145_v63 = vadd.f32 %v2545_v20, %v1144_v60  ;;  %v1338_v20 = vpop.permute.xlu0 %1337 }
 0x349   : > { %v2093_v0 = vpop.eup %2092  ;;  %1895 = vmatprep.mubr.f32.mxu1 %v2091_v62 }
 0x34a   : > { %2102 = vtanh.f32 %v1145_v63  ;;  %1896 = vmatmul.mubr.f32.gmra.mrb[18].mxu1 %v2093_v0 }
 0x34b   : > { %2104 = vtanh.f32 %v1150_v59  ;;  %v1360_v59 = vpop.permute.xlu1 %1359 }
 0x34c   : > { %v2095_v1 = vpop.eup %2094  ;;  %v1342_v23 = vpop.permute.xlu0 %1341 }
 0x34d   : > { %v2097_v3 = vpop.eup %2096  ;;  %1898 = vmatprep.mubr.f32.mxu1 %v2095_v1 }
 0x34e   : > { %1899 = vmatmul.mubr.f32.gmra.mrb[20].mxu1 %v2097_v3 }
 0x350   : > { %v2099_v4 = vpop.eup %2098  ;;  %v1346_v42 = vpop.permute.xlu0 %1345 }
 0x351   : > { %v2101_v5 = vpop.eup %2100  ;;  %1901 = vmatprep.mubr.f32.mxu1 %v2099_v4 }
 0x352   : > { %1902 = vmatmul.mubr.f32.gmra.mrb[22].mxu1 %v2101_v5 }
 0x354   : > { %v2103_v7 = vpop.eup %2102  ;;  %v1350_v30 = vpop.permute.xlu0 %1349 }
 0x355   : > { %v2105_v8 = vpop.eup %2104  ;;  %1904 = vmatprep.mubr.f32.mxu1 %v2103_v7 }
 0x356   : > { %1905 = vmatmul.mubr.f32.gmra.mrb[24].mxu1 %v2105_v8 }
 0x358   : > { %v1354_v47 = vpop.permute.xlu0 %1353 }
 0x35c   : > { %v1358_v1 = vpop.permute.xlu0 %1357 }
 0x40d   : > { %v1885_v25 = vpop.f32.mrb[32].mxu0 }
 0x40e   : > { %v1264_v28 = vadd.f32 %v1885_v25, %v2584_v53  ;;  %v1258_v29 = vpop.f32.mrb[33].mxu0 }
 0x40f   : > { %v1259_v31 = vadd.f32 %v2584_v53, %v1258_v29 }
 0x410   : > { %v1450_v50 = vsel %vm412_vm0, %v1264_v28, %v1340_v19 }
 0x411   : > { %v1467_v61 = vsel %vm1465_vm2, %v1450_v50, %v1404_v22  ;;  %v1449_v33 = vsel %vm412_vm0, %v1259_v31, %v1338_v20  ;;  %v1888_v35 = vpop.f32.mrb[34].mxu0  ;;  %v1364_v20 = vpop.permute.xlu1 %1363 }
 0x412   : > { %v1484_v37 = vsel %vm1482_vm3, %v1467_v61, %v1404_v22  ;;  %v1466_v40 = vsel %vm1465_vm2, %v1449_v33, %v1402_v9  ;;  %v1274_v41 = vadd.f32 %v1888_v35, %v2584_v53  ;;  %v1268_v43 = vpop.f32.mrb[35].mxu0 }
 0x413   : > { %1501 = vst.msk [vmem:[%s2592_s23 + $0x8] sm:$0xff] %vm1499_vm4, %v1484_v37  ;;  %v1483_v58 = vsel %vm1482_vm3, %v1466_v40, %v1402_v9  ;;  %v1269_v6 = vadd.f32 %v2584_v53, %v1268_v43 }
 0x414   : > { %1500 = vst.msk [vmem:[%s2592_s23] sm:$0xff] %vm1499_vm4, %v1483_v58  ;;  %v1452_v46 = vsel %vm412_vm0, %v1274_v41, %v1344_v21  ;;  %v1362_v21 = vpop.permute.xlu0 %1361 }
 0x415   : > { %v1469_v34 = vsel %vm1465_vm2, %v1452_v46, %v1408_v10  ;;  %v1451_v48 = vsel %vm412_vm0, %v1269_v6, %v1342_v23  ;;  %v1891_v49 = vpop.f32.mrb[36].mxu0  ;;  %v1368_v33 = vpop.permute.xlu1 %1367 }
 0x416   : > { %v1486_v51 = vsel %vm1482_vm3, %v1469_v34, %v1408_v10  ;;  %v1468_v2 = vsel %vm1465_vm2, %v1451_v48, %v1406_v11  ;;  %v1284_v16 = vadd.f32 %v1891_v49, %v2584_v53  ;;  %v1278_v52 = vpop.f32.mrb[37].mxu0 }
 0x417   : > { %1503 = vst.msk [vmem:[%s2592_s23 + $0x18] sm:$0xff] %vm1499_vm4, %v1486_v51  ;;  %v1485_v54 = vsel %vm1482_vm3, %v1468_v2, %v1406_v11  ;;  %v1279_v55 = vadd.f32 %v2584_v53, %v1278_v52 }
 0x418   : > { %1502 = vst.msk [vmem:[%s2592_s23 + $0x10] sm:$0xff] %vm1499_vm4, %v1485_v54  ;;  %v1454_v56 = vsel %vm412_vm0, %v1284_v16, %v1348_v24  ;;  %v1366_v41 = vpop.permute.xlu0 %1365 }
 0x419   : > { %v1471_v12 = vsel %vm1465_vm2, %v1454_v56, %v1412_v39  ;;  %v1453_v26 = vsel %vm412_vm0, %v1279_v55, %v1346_v42  ;;  %v1894_v57 = vpop.f32.mrb[16].mxu1  ;;  %v1432_v2 = vpop.permute.xlu1 %1431 }
 0x41a   : > { %v1488_v60 = vsel %vm1482_vm3, %v1471_v12, %v1412_v39  ;;  %v1470_v62 = vsel %vm1465_vm2, %v1453_v26, %v2563_v13  ;;  %v1294_v63 = vadd.f32 %v1894_v57, %v2584_v53  ;;  %v1288_v0 = vpop.f32.mrb[17].mxu1 }
 0x41b   : > { %1505 = vst.msk [vmem:[%s2592_s23 + $0x28] sm:$0xff] %vm1499_vm4, %v1488_v60  ;;  %v1487_v3 = vsel %vm1482_vm3, %v1470_v62, %v2563_v13  ;;  %v1289_v4 = vadd.f32 %v2584_v53, %v1288_v0 }
 0x41c   : > { %1504 = vst.msk [vmem:[%s2592_s23 + $0x20] sm:$0xff] %vm1499_vm4, %v1487_v3  ;;  %v1456_v5 = vsel %vm412_vm0, %v1294_v63, %v1352_v27 }
 0x41d   : > { %v1473_v7 = vsel %vm1465_vm2, %v1456_v5, %v2565_v32  ;;  %v1455_v8 = vsel %vm412_vm0, %v1289_v4, %v1350_v30  ;;  %v1897_v22 = vpop.f32.mrb[18].mxu1 }
 0x41e   : > { %v1490_v9 = vsel %vm1482_vm3, %v1473_v7, %v2565_v32  ;;  %v1472_v10 = vsel %vm1465_vm2, %v1455_v8, %v2567_v38  ;;  %v1304_v11 = vadd.f32 %v1897_v22, %v2584_v53  ;;  %v1298_v39 = vpop.f32.mrb[19].mxu1 }
 0x41f   : > { %1507 = vst.msk [vmem:[%s2592_s23 + $0x38] sm:$0xff] %vm1499_vm4, %v1490_v9  ;;  %v1489_v13 = vsel %vm1482_vm3, %v1472_v10, %v2567_v38  ;;  %v1299_v19 = vadd.f32 %v2584_v53, %v1298_v39 }
 0x420   : > { %1506 = vst.msk [vmem:[%s2592_s23 + $0x30] sm:$0xff] %vm1499_vm4, %v1489_v13  ;;  %v1458_v32 = vsel %vm412_vm0, %v1304_v11, %v1356_v44 }
 0x421   : > { %v1475_v23 = vsel %vm1465_vm2, %v1458_v32, %v2569_v14  ;;  %v1457_v24 = vsel %vm412_vm0, %v1299_v19, %v1354_v47  ;;  %v1900_v42 = vpop.f32.mrb[20].mxu1 }
 0x422   : > { %v1492_v25 = vsel %vm1482_vm3, %v1475_v23, %v2569_v14  ;;  %v1474_v38 = vsel %vm1465_vm2, %v1457_v24, %v2571_v15  ;;  %v1314_v27 = vadd.f32 %v1900_v42, %v2584_v53  ;;  %v1308_v28 = vpop.f32.mrb[21].mxu1 }
 0x423   : > { %1509 = vst.msk [vmem:[%s2592_s23 + $0x48] sm:$0xff] %vm1499_vm4, %v1492_v25  ;;  %v1491_v29 = vsel %vm1482_vm3, %v1474_v38, %v2571_v15  ;;  %v1309_v30 = vadd.f32 %v2584_v53, %v1308_v28 }
 0x424   : > { %1508 = vst.msk [vmem:[%s2592_s23 + $0x40] sm:$0xff] %vm1499_vm4, %v1491_v29  ;;  %v1460_v31 = vsel %vm412_vm0, %v1314_v27, %v1360_v59 }
 0x425   : > { %v1477_v14 = vsel %vm1465_vm2, %v1460_v31, %v2573_v17  ;;  %v1459_v50 = vsel %vm412_vm0, %v1309_v30, %v1358_v1  ;;  %v1903_v61 = vpop.f32.mrb[22].mxu1 }
 0x426   : > { %v1494_v35 = vsel %vm1482_vm3, %v1477_v14, %v2573_v17  ;;  %v1476_v15 = vsel %vm1465_vm2, %v1459_v50, %v2575_v18  ;;  %v1324_v37 = vadd.f32 %v1903_v61, %v2584_v53  ;;  %v1318_v40 = vpop.f32.mrb[23].mxu1 }
 0x427   : > { %1511 = vst.msk [vmem:[%s2592_s23 + $0x58] sm:$0xff] %vm1499_vm4, %v1494_v35  ;;  %v1493_v43 = vsel %vm1482_vm3, %v1476_v15, %v2575_v18  ;;  %v1319_v58 = vadd.f32 %v2584_v53, %v1318_v40 }
 0x428   : > { %1510 = vst.msk [vmem:[%s2592_s23 + $0x50] sm:$0xff] %vm1499_vm4, %v1493_v43  ;;  %v1462_v17 = vsel %vm412_vm0, %v1324_v37, %v1364_v20 }
 0x429   : > { %v1479_v6 = vsel %vm1465_vm2, %v1462_v17, %v2577_v45  ;;  %v1461_v44 = vsel %vm412_vm0, %v1319_v58, %v1362_v21  ;;  %v1906_v46 = vpop.f32.mrb[24].mxu1 }
 0x42a   : > { %v1496_v47 = vsel %vm1482_vm3, %v1479_v6, %v2577_v45  ;;  %v1478_v34 = vsel %vm1465_vm2, %v1461_v44, %v2579_v36  ;;  %v1334_v18 = vadd.f32 %v1906_v46, %v2584_v53  ;;  %v1328_v48 = vpop.f32.mrb[25].mxu1  ;;  %v1430_v45 = vpop.permute.xlu0 %1429 }
 0x42b   : > { %1513 = vst.msk [vmem:[%s2592_s23 + $0x68] sm:$0xff] %vm1499_vm4, %v1496_v47  ;;  %v1495_v49 = vsel %vm1482_vm3, %v1478_v34, %v2579_v36  ;;  %v1329_v51 = vadd.f32 %v2584_v53, %v1328_v48 }
 0x42c   : > { %1512 = vst.msk [vmem:[%s2592_s23 + $0x60] sm:$0xff] %vm1499_vm4, %v1495_v49  ;;  %v1464_v16 = vsel %vm412_vm0, %v1334_v18, %v1368_v33 }
 0x42d   : > { %v1481_v52 = vsel %vm1465_vm2, %v1464_v16, %v1432_v2  ;;  %v1463_v54 = vsel %vm412_vm0, %v1329_v51, %v1366_v41 }
 0x42e   : > { %v1498_v55 = vsel %vm1482_vm3, %v1481_v52, %v1432_v2  ;;  %v1480_v56 = vsel %vm1465_vm2, %v1463_v54, %v1430_v45 }
 0x42f   : > { %1515 = vst.msk [vmem:[%s2592_s23 + $0x78] sm:$0xff] %vm1499_vm4, %v1498_v55  ;;  %v1497_v36 = vsel %vm1482_vm3, %v1480_v56, %v1430_v45 }
 0x430   : > { %1514 = vst.msk [vmem:[%s2592_s23 + $0x70] sm:$0xff] %vm1499_vm4, %v1497_v36 }
 0x431 PF: > { %s20_s13 = sadd.s32 1, %s2112_s13  }
 0x432   : > { %p17_p4 = scmp.ge.s32.totalorder %s20_s13, 4  }
 0x434   :  { %19 = sbr.rel (!%p17_p4) target bundleno = 1 (0x1), region = 93 }

</bundles_post_ra>
